<compile_context>
chip_gen: v7x
topology: tpu7x:2x2x1
jax: 0.10.0
libtpu: 0.0.40
codegen_flags: <defaults>
</compile_context>

<pallas_src>
import jax
import jax.numpy as jnp
import numpy as np
from jax.experimental import pallas as pl
from jax.experimental.pallas import tpu as pltpu

# ---------------- config (small, consistent with the module) ----------------
BATCH = 2
SEQ = 8
D_MODEL = 32
FF = 64            # dim_feedforward (logical)
FF_PAD = 128       # lane-dense padded feed-forward width
EPS = 1e-5         # nn.LayerNorm default


# ---------------------------- Pallas kernel ---------------------------------
def sentence_layer_kernel(x_ref, w1_ref, w2_ref, slab_ref, o_ref):
    """Fused linear1 -> ReLU -> linear2 -> residual -> LayerNorm.

    x_ref    : (B*S, D)        f32 activations, batch folded onto sublanes
    w1_ref   : (D, FF_PAD)     bf16 pre-transposed linear1 weight, FF zero-padded
    w2_ref   : (FF_PAD, D)     bf16 pre-transposed linear2 weight, FF zero-padded
    slab_ref : (4, FF_PAD)     f32 packed params:
                                 row 0 : b1   (lanes [0:FF], rest 0)
                                 row 1 : b2   (lanes [0:D],  rest 0)
                                 row 2 : gamma(lanes [0:D],  rest 0)
                                 row 3 : beta (lanes [0:D],  rest 0)
    o_ref    : (B*S, D)        f32
    """
    x = x_ref[...]                                   # (N, D) f32
    slab = slab_ref[...]                             # (4, FF_PAD) f32
    b1 = slab[0:1, :]                                # (1, FF_PAD)
    b2 = slab[1:2, :D_MODEL]                         # (1, D)
    gamma = slab[2:3, :D_MODEL]                      # (1, D)
    beta = slab[3:4, :D_MODEL]                       # (1, D)

    # linear1 + ReLU (bf16 MXU operands, f32 accumulate; pad lanes stay 0)
    h = jnp.dot(x.astype(jnp.bfloat16), w1_ref[...],
                preferred_element_type=jnp.float32) + b1      # (N, FF_PAD)
    h = jnp.maximum(h, 0.0)

    # linear2 + residual (padded FF rows/cols are zero -> contribute nothing)
    y = x + jnp.dot(h.astype(jnp.bfloat16), w2_ref[...],
                    preferred_element_type=jnp.float32) + b2  # (N, D)

    # LayerNorm, single-pass statistics (divide by true D, not the padded width)
    inv_d = 1.0 / D_MODEL
    s1 = jnp.sum(y, axis=-1, keepdims=True)
    s2 = jnp.sum(y * y, axis=-1, keepdims=True)
    mu = s1 * inv_d
    var = s2 * inv_d - mu * mu
    o_ref[...] = (y - mu) * jax.lax.rsqrt(var + EPS) * gamma + beta


# ------------------------------ wrapper --------------------------------------
@jax.jit
def sentence_processing_layer(x, w1t_pad_bf16, w2t_pad_bf16, slab):
    """x: (B, S, D) float32 -> (B, S, D) float32."""
    B, S, D = x.shape
    x2 = x.reshape(B * S, D).astype(jnp.float32)      # fold batch onto sublanes

    vmem = pl.BlockSpec(memory_space=pltpu.MemorySpace.VMEM)   # whole-array block
    out = pl.pallas_call(
        sentence_layer_kernel,
        out_shape=jax.ShapeDtypeStruct((B * S, D), jnp.float32),
        in_specs=[vmem] * 4,
        out_specs=vmem,
    )(x2, w1t_pad_bf16, w2t_pad_bf16, slab)

    return out.reshape(B, S, D)


# ------------------------- pure-JAX references --------------------------------
def ref_forward_f32(x, params):
    """PyTorch-equivalent full-f32 math (semantics check)."""
    h = jax.nn.relu(x @ params["w1t"] + params["b1"])
    y = x + h @ params["w2t"] + params["b2"]
    mu = jnp.mean(y, axis=-1, keepdims=True)
    var = jnp.mean((y - mu) ** 2, axis=-1, keepdims=True)
    return (y - mu) / jnp.sqrt(var + EPS) * params["gamma"] + params["beta"]


def ref_forward_bf16(x, params):
    """Mimics the kernel's math exactly (bf16 MXU operands, f32 accumulation)."""
    slab = params["slab"]
    b1 = slab[0]
    b2 = slab[1, :D_MODEL]
    gamma = slab[2, :D_MODEL]
    beta = slab[3, :D_MODEL]
    h = jnp.dot(x.astype(jnp.bfloat16), params["w1t_pad_bf16"],
                preferred_element_type=jnp.float32) + b1
    h = jnp.maximum(h, 0.0)
    y = x + jnp.dot(h.astype(jnp.bfloat16), params["w2t_pad_bf16"],
                    preferred_element_type=jnp.float32) + b2
    mu = jnp.mean(y, axis=-1, keepdims=True)
    var = jnp.mean((y - mu) ** 2, axis=-1, keepdims=True)
    return (y - mu) * jax.lax.rsqrt(var + EPS) * gamma + beta


# --------------------------- parameter init -----------------------------------
def init_params(key):
    k1, k2, k3, k4 = jax.random.split(key, 4)
    # PyTorch nn.Linear stores (out, in); pre-transpose ONCE here so the kernel
    # consumes a lane-contiguous RHS with no in-kernel transposes.
    w1 = jax.random.normal(k1, (FF, D_MODEL), jnp.float32) * 0.05   # linear1.weight
    w2 = jax.random.normal(k2, (D_MODEL, FF), jnp.float32) * 0.05   # linear2.weight
    b1 = jax.random.normal(k3, (FF,), jnp.float32) * 0.02
    b2 = jax.random.normal(k4, (D_MODEL,), jnp.float32) * 0.02
    gamma = jnp.ones((D_MODEL,), jnp.float32)
    beta = jnp.zeros((D_MODEL,), jnp.float32)

    w1t = jnp.transpose(w1)                                          # (D, FF)
    w2t = jnp.transpose(w2)                                          # (FF, D)

    # Lane-dense zero-padded (FF -> 128) bf16 kernel weights.
    w1t_pad = jnp.zeros((D_MODEL, FF_PAD), jnp.float32).at[:, :FF].set(w1t)
    w2t_pad = jnp.zeros((FF_PAD, D_MODEL), jnp.float32).at[:FF, :].set(w2t)

    # Pack the four small row vectors into one (4, 128) slab -> single DMA.
    slab = jnp.zeros((4, FF_PAD), jnp.float32)
    slab = slab.at[0, :FF].set(b1)
    slab = slab.at[1, :D_MODEL].set(b2)
    slab = slab.at[2, :D_MODEL].set(gamma)
    slab = slab.at[3, :D_MODEL].set(beta)

    return {
        # full-f32 reference params (PyTorch-equivalent math)
        "w1t": w1t, "b1": b1, "w2t": w2t, "b2": b2,
        "gamma": gamma, "beta": beta,
        # kernel params
        "w1t_pad_bf16": w1t_pad.astype(jnp.bfloat16),
        "w2t_pad_bf16": w2t_pad.astype(jnp.bfloat16),
        "slab": slab,
    }


# ------------------------------ main -------------------------------------------
if __name__ == "__main__":
    key = jax.random.PRNGKey(0)
    pkey, xkey = jax.random.split(key)
    params = init_params(pkey)

    x = jax.random.normal(xkey, (BATCH, SEQ, D_MODEL), jnp.float32)

    out = sentence_processing_layer(
        x, params["w1t_pad_bf16"], params["w2t_pad_bf16"], params["slab"])
    out = jax.block_until_ready(out)
    assert out.shape == (BATCH, SEQ, D_MODEL), out.shape

    # (1) Exactness vs. a pure-JAX re-implementation of the same (bf16-operand,
    #     f32-accumulate) math.
    ref_bf16 = jax.block_until_ready(ref_forward_bf16(x, params))
    np.testing.assert_allclose(np.asarray(out), np.asarray(ref_bf16),
                               atol=1e-4, rtol=1e-4)

    # (2) Semantics vs. the original full-f32 PyTorch-equivalent forward
    #     (looser tolerance accounts for the bf16 MXU operands, per perf review).
    ref_f32 = jax.block_until_ready(ref_forward_f32(x, params))
    np.testing.assert_allclose(np.asarray(out), np.asarray(ref_f32),
                               atol=2e-2, rtol=2e-2)

    print("KERNEL_OK")
</pallas_src>

<mosaic_0001>
module attributes {stable_mosaic.version = 11 : i64} {
  func.func @sentence_layer_kernel(%arg0: memref<16x32xf32, #tpu.memory_space<vmem>>, %arg1: memref<32x128xbf16, #tpu.memory_space<vmem>>, %arg2: memref<128x32xbf16, #tpu.memory_space<vmem>>, %arg3: memref<4x128xf32, #tpu.memory_space<vmem>>, %arg4: memref<16x32xf32, #tpu.memory_space<vmem>>) attributes {dimension_semantics = [], scalar_prefetch = 0 : i64, scratch_operands = 0 : i64, tpu.core_type = #tpu.core_type<tc>} {
    %c0 = arith.constant 0 : index
    %c0_0 = arith.constant 0 : index
    %0 = vector.load %arg0[%c0, %c0_0] : memref<16x32xf32, #tpu.memory_space<vmem>>, vector<16x32xf32>
    %c0_1 = arith.constant 0 : index
    %c0_2 = arith.constant 0 : index
    %1 = vector.load %arg3[%c0_1, %c0_2] : memref<4x128xf32, #tpu.memory_space<vmem>>, vector<4x128xf32>
    %2 = vector.extract_strided_slice %1 {offsets = [0, 0], sizes = [1, 128], strides = [1, 1]} : vector<4x128xf32> to vector<1x128xf32>
    %3 = vector.extract_strided_slice %1 {offsets = [1, 0], sizes = [1, 32], strides = [1, 1]} : vector<4x128xf32> to vector<1x32xf32>
    %4 = vector.extract_strided_slice %1 {offsets = [2, 0], sizes = [1, 32], strides = [1, 1]} : vector<4x128xf32> to vector<1x32xf32>
    %5 = vector.extract_strided_slice %1 {offsets = [3, 0], sizes = [1, 32], strides = [1, 1]} : vector<4x128xf32> to vector<1x32xf32>
    %6 = arith.truncf %0 : vector<16x32xf32> to vector<16x32xbf16>
    %c0_3 = arith.constant 0 : index
    %c0_4 = arith.constant 0 : index
    %7 = vector.load %arg1[%c0_3, %c0_4] : memref<32x128xbf16, #tpu.memory_space<vmem>>, vector<32x128xbf16>
    %cst = arith.constant dense<0.000000e+00> : vector<16x128xf32>
    %8 = tpu.matmul %6, %7, %cst {dimension_numbers = #tpu.dot_dimension_numbers<[1], [0], [0], [1], [0, 0, 1, 1], [], []>} : vector<16x32xbf16>, vector<32x128xbf16>, vector<16x128xf32> -> vector<16x128xf32>
    %9 = vector.broadcast %2 : vector<1x128xf32> to vector<16x128xf32>
    %10 = arith.addf %8, %9 : vector<16x128xf32>
    %cst_5 = arith.constant 0.000000e+00 : f32
    %11 = vector.broadcast %cst_5 : f32 to vector<16x128xf32>
    %12 = arith.maximumf %10, %11 : vector<16x128xf32>
    %13 = arith.truncf %12 : vector<16x128xf32> to vector<16x128xbf16>
    %c0_6 = arith.constant 0 : index
    %c0_7 = arith.constant 0 : index
    %14 = vector.load %arg2[%c0_6, %c0_7] : memref<128x32xbf16, #tpu.memory_space<vmem>>, vector<128x32xbf16>
    %cst_8 = arith.constant dense<0.000000e+00> : vector<16x32xf32>
    %15 = tpu.matmul %13, %14, %cst_8 {dimension_numbers = #tpu.dot_dimension_numbers<[1], [0], [0], [1], [0, 0, 1, 1], [], []>} : vector<16x128xbf16>, vector<128x32xbf16>, vector<16x32xf32> -> vector<16x32xf32>
    %16 = arith.addf %0, %15 : vector<16x32xf32>
    %17 = vector.broadcast %3 : vector<1x32xf32> to vector<16x32xf32>
    %18 = arith.addf %16, %17 : vector<16x32xf32>
    %cst_9 = arith.constant dense<0.000000e+00> : vector<16xf32>
    %19 = vector.multi_reduction <add>, %18, %cst_9 [1] : vector<16x32xf32> to vector<16xf32>
    %20 = vector.shape_cast %19 : vector<16xf32> to vector<16x1xf32>
    %21 = arith.mulf %18, %18 : vector<16x32xf32>
    %cst_10 = arith.constant dense<0.000000e+00> : vector<16xf32>
    %22 = vector.multi_reduction <add>, %21, %cst_10 [1] : vector<16x32xf32> to vector<16xf32>
    %23 = vector.shape_cast %22 : vector<16xf32> to vector<16x1xf32>
    %cst_11 = arith.constant 3.125000e-02 : f32
    %24 = vector.broadcast %cst_11 : f32 to vector<16x1xf32>
    %25 = arith.mulf %20, %24 : vector<16x1xf32>
    %cst_12 = arith.constant 3.125000e-02 : f32
    %26 = vector.broadcast %cst_12 : f32 to vector<16x1xf32>
    %27 = arith.mulf %23, %26 : vector<16x1xf32>
    %28 = arith.mulf %25, %25 : vector<16x1xf32>
    %29 = arith.subf %27, %28 : vector<16x1xf32>
    %30 = vector.broadcast %25 : vector<16x1xf32> to vector<16x32xf32>
    %31 = arith.subf %18, %30 : vector<16x32xf32>
    %cst_13 = arith.constant 9.99999974E-6 : f32
    %32 = vector.broadcast %cst_13 : f32 to vector<16x1xf32>
    %33 = arith.addf %29, %32 : vector<16x1xf32>
    %34 = math.rsqrt %33 : vector<16x1xf32>
    %35 = vector.broadcast %34 : vector<16x1xf32> to vector<16x32xf32>
    %36 = arith.mulf %31, %35 : vector<16x32xf32>
    %37 = vector.broadcast %4 : vector<1x32xf32> to vector<16x32xf32>
    %38 = arith.mulf %36, %37 : vector<16x32xf32>
    %39 = vector.broadcast %5 : vector<1x32xf32> to vector<16x32xf32>
    %40 = arith.addf %38, %39 : vector<16x32xf32>
    %c0_14 = arith.constant 0 : index
    %c0_15 = arith.constant 0 : index
    %41 = vector.load %arg4[%c0_14, %c0_15] : memref<16x32xf32, #tpu.memory_space<vmem>>, vector<16x32xf32>
    tpu.vector_store %arg4[%c0_14, %c0_15], %40 {strides = array<i32>} : memref<16x32xf32, #tpu.memory_space<vmem>>, vector<16x32xf32>,
    return
  }
}

</mosaic_0001>

<bundles_post_ra>
// kernel: sentence_processing_layer.1
= control target key start
LH: loop header
LB: loop body
LE: loop exit
PB: predicated region body
PF: predicated region fallthrough
CT: control target
= control target key end

     0   :  { %v358_v1 = vmov 0.0   ;;  %vm359_vm0 = vmmov 0   ;;  %vm43_vm1 = vcmask 261120   ;;  %s446_s0 = inlined_call_operand.vmem [shape: f32[16,32], index: 0, kind: input, shape index: {}]   ;;  %s447_s1 = inlined_call_operand.vmem [shape: bf16[32,128], index: 1, kind: input, shape index: {}]   ;;  %s448_s2 = inlined_call_operand.vmem [shape: bf16[128,32], index: 2, kind: input, shape index: {}]   ;;  %s449_s3 = inlined_call_operand.vmem [shape: f32[4,128], index: 3, kind: input, shape index: {}]   ;;  %s450_s4 = inlined_call_operand.hbm [shape: f32[16,32], index: 4, kind: output, shape index: {}]  }
   0x1   :  { %v320_v0 = vld [vmem:[%s447_s1] sm:$0xff]   ;;  %287 = vmatprep.subr.bf16.mxu0 %v358_v1  ;;  %v321_v2 = vld [vmem:[%s447_s1 + $0x8] sm:$0xff]   ;;  %295 = vmatprep.subr.bf16.mxu1 %v358_v1  ;;  %v324_v8 = vld [vmem:[%s448_s2 + $0x10] sm:$0xff]  }
   0x2   :  { %288 = vmatpush3.bf16.msra.mxu0 %v320_v0  ;;  %291 = vmatprep.mubr.msk.bf16.mxu0 %vm359_vm0, %v358_v1  ;;  %v19_v3 = vld [vmem:[%s446_s0] sm:$0xff]  ;;  %v20_v4 = vld [vmem:[%s446_s0 + $0x8] sm:$0xff] }
   0x3   :  { %289 = vmatprep.subr.bf16.mxu0 %v358_v1  ;;  %v322_v5 = vld [vmem:[%s448_s2] sm:$0xff]   ;;  %311 = vmatprep.mubr.msk.bf16.mxu1 %vm359_vm0, %v358_v1  ;;  %v22_v6 = vpack.c.bf16 %v20_v4, %v19_v3  ;;  %v323_v7 = vld [vmem:[%s448_s2 + $0x8] sm:$0xff]  }
   0x4   :  { %296 = vmatpush3.bf16.msra.mxu1 %v322_v5 }
   0x5   :  { %297 = vmatprep.subr.bf16.mxu1 %v358_v1 }
   0x6   :  { %290 = vmatpush3.bf16.msra.mxu0 %v321_v2 }
   0x8   :  { %298 = vmatpush3.bf16.msra.mxu1 %v323_v7 }
   0x9   :  { %292 = vmatmul.mubr.msk.bf16.vlgmr.msra.gmra.mrb[0].mxu0 %vm43_vm1, %v22_v6  ;;  %299 = vmatprep.subr.bf16.mxu1 %v358_v1 }
   0xa   :  { %9 = vsyncpa [#allocation3], 0  ;;  %v325_v9 = vld [vmem:[%s448_s2 + $0x18] sm:$0xff]   ;;  %v326_v10 = vld [vmem:[%s448_s2 + $0x20] sm:$0xff]   ;;  %v27_v14 = vlaneseq }
   0xb   :  { %v327_v11 = vld [vmem:[%s448_s2 + $0x28] sm:$0xff]   ;;  %v328_v12 = vld [vmem:[%s448_s2 + $0x30] sm:$0xff]   ;;  %v329_v13 = vld [vmem:[%s448_s2 + $0x38] sm:$0xff]   ;;  %s360_s2 = smov [#allocation2]  }
   0xc   :  { %300 = vmatpush3.bf16.msra.mxu1 %v324_v8  ;;  %v28_v15 = vshrl.u32 %v27_v14, 7  ;;  %v21_v17 = vld [vmem:[%s449_s3] sm:$0xf]  ;;  %s253_s3 = sshll.u32 %s360_s2, 4  ;;  %s254_s3 = int_to_ptr.vmem [resolvable:$true] %s253_s3 }
   0xd   :  { %301 = vmatprep.subr.bf16.mxu1 %v358_v1  ;;  %s334_s13 = scalar_lea.vmem %s254_s3, 256  ;;  %p339_p1 = scmp.lt.s32.totalorder %s254_s3, %s254_s3 }
   0xe   :  { %v29_v16 = vsub.s32 0, %v28_v15  ;;  %v200_v28 = vsub.s32 1, %v28_v15  ;;  %v236_v58 = vsub.s32 2, %v28_v15  ;;  %v242_v59 = vsub.s32 3, %v28_v15  ;;  %p335_p0 = scmp.ne.s32.totalorder %s254_s3, %s334_s13  ;;  %p340_p2 = scmp.lt.s32.totalorder %s334_s13, %s334_s13 }
  0x10   :  { %302 = vmatpush3.bf16.msra.mxu1 %v325_v9  ;;  %v30_v18 = vrot.slane %v21_v17, %v29_v16  ;;  %v201_v29 = vrot.slane %v21_v17, %v200_v28  ;;  %v237_v60 = vrot.slane %v21_v17, %v236_v58  ;;  %v243_v63 = vrot.slane %v21_v17, %v242_v59  ;;  %p341_p3 = por %p340_p2, %p339_p1 }
  0x11   :  { %303 = vmatprep.subr.bf16.mxu1 %v358_v1 }
  0x12   :  { %p342_p4 = pnand %p341_p3, %p335_p0 }
  0x14   :  { %304 = vmatpush3.bf16.msra.mxu1 %v326_v10 }
  0x15   :  { %305 = vmatprep.subr.bf16.mxu1 %v358_v1 }
  0x18   :  { %306 = vmatpush3.bf16.msra.mxu1 %v327_v11 }
  0x19   :  { %307 = vmatprep.subr.bf16.mxu1 %v358_v1 }
  0x1c   :  { %308 = vmatpush3.bf16.msra.mxu1 %v328_v12 }
  0x1d   :  { %309 = vmatprep.subr.bf16.mxu1 %v358_v1 }
  0x20   :  { %310 = vmatpush3.bf16.msra.mxu1 %v329_v13 }
  0xdc   :  { %v81_v19 = vpop.f32.mrb[0].mxu0 }
  0xdd   :  { %v82_v20 = vadd.f32 %v81_v19, %v30_v18  ;;  %v293_v21 = vpop.f32.mrb[1].mxu0 }
  0xde   :  { %v84_v22 = vpop.f32.mrb[2].mxu0 }
  0xdf   :  { %v85_v23 = vadd.f32 %v84_v22, %v30_v18  ;;  %v294_v24 = vpop.f32.mrb[3].mxu0  ;;  %v88_v25 = vmax.f32 %v82_v20, 0.0 }
  0xe1   :  { %v89_v26 = vmax.f32 %v85_v23, 0.0 }
  0xe3   :  { %v90_v27 = vpack.c.bf16 %v89_v26, %v88_v25 }
  0xe5   :  { %312 = vmatmul.mubr.bf16.vlgmr.msra.gmra.mrb[0].mxu1 %v90_v27 }
 0x1b8   :  { %v189_v30 = vpop.f32.mrb[0].mxu1 }
 0x1b9   :  { %v196_v31 = vadd.f32 %v189_v30, %v19_v3  ;;  %v313_v32 = vpop.f32.mrb[1].mxu1 }
 0x1ba   :  { %v192_v33 = vpop.f32.mrb[2].mxu1 }
 0x1bb   :  { %v202_v34 = vadd.f32 %v201_v29, %v196_v31  ;;  %v197_v35 = vadd.f32 %v192_v33, %v20_v4  ;;  %v314_v36 = vpop.f32.mrb[3].mxu1 }
 0x1bd   :  { %v203_v37 = vadd.f32 %v201_v29, %v197_v35  ;;  %v204_v38 = vsel %vm43_vm1, %v202_v34, 0.0  ;;  %v210_v39 = vmul.f32 %v202_v34, %v202_v34 }
 0x1be   :  { %205 = vadd.xlane.f32.xlu0 %v204_v38 }
 0x1bf   :  { %v212_v40 = vsel %vm43_vm1, %v210_v39, 0.0  ;;  %v211_v41 = vmul.f32 %v203_v37, %v203_v37  ;;  %v207_v42 = vsel %vm43_vm1, %v203_v37, 0.0 }
 0x1c0   :  { %213 = vadd.xlane.f32.xlu1 %v212_v40 }
 0x1c1   :  { %v215_v43 = vsel %vm43_vm1, %v211_v41, 0.0 }
 0x1c2   :  { %208 = vadd.xlane.f32.xlu0 %v207_v42 }
 0x1c4   :  { %216 = vadd.xlane.f32.xlu1 %v215_v43 }
 0x24b   :  { %v206_v44 = vpop.xlane.xlu0 %205 }
 0x24c   :  { %v218_v45 = vmul.f32 0.03125, %v206_v44 }
 0x24d   :  { %v214_v46 = vpop.xlane.xlu1 %213 }
 0x24e   :  { %v222_v47 = vmul.f32 %v218_v45, %v218_v45  ;;  %v220_v48 = vmul.f32 0.03125, %v214_v46  ;;  %v226_v61 = vsub.f32 %v202_v34, %v218_v45 }
 0x24f   :  { %v209_v49 = vpop.xlane.xlu0 %208 }
 0x250   :  { %v224_v50 = vsub.f32 %v220_v48, %v222_v47  ;;  %v219_v51 = vmul.f32 0.03125, %v209_v49 }
 0x251   :  { %v217_v52 = vpop.xlane.xlu1 %216 }
 0x252   :  { %v228_v53 = vadd.f32 1e-05, %v224_v50  ;;  %v223_v54 = vmul.f32 %v219_v51, %v219_v51  ;;  %v221_v55 = vmul.f32 0.03125, %v217_v52  ;;  %v227_v1 = vsub.f32 %v203_v37, %v219_v51 }
 0x254   :  { %330 = vrsqrt.f32 %v228_v53  ;;  %v225_v56 = vsub.f32 %v221_v55, %v223_v54 }
 0x256   :  { %v229_v57 = vadd.f32 1e-05, %v225_v56 }
 0x258   :  { %332 = vrsqrt.f32 %v229_v57 }
 0x25e   :  { %v331_v62 = vpop.eup %330 }
 0x25f   :  { %v232_v0 = vmul.f32 %v331_v62, %v226_v61 }
 0x261   :  { %v238_v2 = vmul.f32 %v237_v60, %v232_v0 }
 0x262   :  { %v333_v3 = vpop.eup %332 }
 0x263   :  { %v233_v4 = vmul.f32 %v333_v3, %v227_v1  ;;  %v244_v5 = vadd.f32 %v243_v63, %v238_v2 }
 0x265   :  { %v239_v6 = vmul.f32 %v237_v60, %v233_v4  ;;  %246 = vst.msk [vmem:[#allocation2] sm:$0xff] %vm43_vm1, %v244_v5 }
 0x267   :  { %v245_v7 = vadd.f32 %v243_v63, %v239_v6 }
 0x269   :  { %247 = vst.msk [vmem:[#allocation2 + $0x8] sm:$0xff] %vm43_vm1, %v245_v7 }
 0x26a   :  { %345 = shalt.err (!%p342_p4)
}
 0x26b   :  { %s346_s16 = scalar_lea.hbm %s450_s4, 256 }
 0x26c   :  { %p347_p5 = scmp.ne.s32.totalorder %s450_s4, %s346_s16  ;;  %p350_p6 = scmp.lt.u32.totalorder %s346_s16, %s450_s4 }
 0x26e   :  { %p352_p7 = pnand %p350_p6, %p347_p5 }
 0x270   :  { %355 = shalt.err (!%p352_p7)
}
 0x271   :  { %s361_s21 = smov 128   ;;  %s362_s22 = smov 8  }
 0x272   :  { %259 = dma.vmem_to_hbm [thread:$0]  %s254_s3, 256, %s450_s4, [#allocation3], %s361_s21, %s361_s21, %s362_s22  }
 0x273   :  { %356 = dma.done.wait [#allocation3], 256  }
 0x274   :  { %357 = vsyncadd [#allocation3], 4294967040 }
 0x275   :  { %263 = vsyncpa [#allocation3], 1 }

</bundles_post_ra>
